<compile_context>
chip_gen: v7x
topology: tpu7x:2x2x1
jax: 0.10.0
libtpu: 0.0.40
codegen_flags: <defaults>
</compile_context>

<pallas_src>
import functools

import jax
import jax.numpy as jnp
from jax.experimental import pallas as pl
from jax.experimental.pallas import tpu as pltpu

# ----------------------------- small config ---------------------------------
B = 2                     # batch
C = 3                     # image channels
IMG = 16                  # spatial
PATCH = 4
NP = (IMG // PATCH) ** 2              # 16 patches == sequence length
PATCH_DIM = C * PATCH * PATCH         # 48
VISION_DIM = 32                       # (768 in the real module)
LLM_DIM = 128                         # lane-dense toy dim (2048 in the real module)
HEADS = 8
HEAD_DIM = LLM_DIM // HEADS           # 16
ACTION_DIM = 17
ACT_PAD = 128                         # action dim zero-padded to a full vreg
DIFF_HIDDEN = 64                      # (512 in the real module)
HID_PAD = 128                         # diffusion hidden dim zero-padded
NUM_DIFF_STEPS = 5                    # (20 in the real module)
CONTRAST_DIMS = (128, 128, 128)       # (1024, 512, 128 in the real module)
N_ADAPT = 2                           # len(stages) - 1

F32 = jnp.float32
WDT = jnp.bfloat16                    # weights
ACT_DTYPE = jnp.bfloat16              # inter-kernel activations


# ------------------------------ spec helpers ---------------------------------
def _rep_spec(shape):
    """Whole-array block, replicated at every grid point."""
    n = len(shape)
    return pl.BlockSpec(shape, lambda *_, _n=n: (0,) * _n)


def _batch_spec(S, D):
    """(B, S, D) array, one batch element per grid step (batch dim squeezed)."""
    return pl.BlockSpec((None, S, D), lambda b: (b, 0, 0))


# ---------------------------- in-kernel helpers -------------------------------
def _f32(ref):
    return ref[...].astype(jnp.float32)


def _mm(x, w):
    """bf16 x bf16 MXU matmul with f32 accumulation."""
    return jnp.dot(x.astype(jnp.bfloat16), w.astype(jnp.bfloat16),
                   preferred_element_type=jnp.float32)


def _layernorm(h, g_ref, b_ref, eps=1e-5):
    mu = jnp.mean(h, axis=-1, keepdims=True)
    var = jnp.mean((h - mu) ** 2, axis=-1, keepdims=True)
    return (h - mu) * jax.lax.rsqrt(var + eps) * _f32(g_ref) + _f32(b_ref)


def _mha(x, ctx, wq, bq, wkv, bkv, wo, bo, *, heads, scale):
    """Fused multi-head attention entirely on VMEM values.

    x: [Sq, D] f32, ctx: [Sk, D] f32.  Head split/merge is done with static
    lane slices (no HBM transposes); concat-over-heads followed by @wo is
    rewritten as a sum of per-head partial matmuls against wo row-slices.
    Matches CrossAttention.forward with scale = llm_dim ** -0.5.
    """
    Sq, D = x.shape
    dh = D // heads
    q = _mm(x, wq[...]) + _f32(bq)          # [Sq, D]  f32
    kv = _mm(ctx, wkv[...]) + _f32(bkv)     # [Sk, 2D] f32
    k = kv[:, :D]
    v = kv[:, D:]
    out = jnp.zeros((Sq, D), jnp.float32)
    for h in range(heads):                  # static unroll; all data in vregs
        lo = h * dh
        qh = q[:, lo:lo + dh]
        kh = k[:, lo:lo + dh]
        vh = v[:, lo:lo + dh]
        s = jax.lax.dot_general(qh, kh, (((1,), (1,)), ((), ())),
                                preferred_element_type=jnp.float32) * scale
        s = s - jnp.max(s, axis=-1, keepdims=True)
        p = jnp.exp(s)
        attn = p * pl.reciprocal(jnp.sum(p, axis=-1, keepdims=True), approx=True)
        oh = jnp.dot(attn, vh, preferred_element_type=jnp.float32)   # [Sq, dh]
        out = out + _mm(oh, wo[lo:lo + dh, :])
    return out + _f32(bo)


# ------------------------------- kernels -------------------------------------
def _vision_kernel(*refs, n_adapt):
    # refs = [x, patch_w, patch_b, (aw, ab, ag, agb) * n_adapt,
    #         vp_w1, vp_b1, vp_g, vp_b, vp_w2, vp_b2, o_ref]
    x_ref = refs[0]
    pw, pb = refs[1], refs[2]
    idx = 3
    adapt_refs = []
    for _ in range(n_adapt):
        adapt_refs.append(refs[idx:idx + 4])
        idx += 4
    w1, b1, g, gb, w2, b2 = refs[idx:idx + 6]
    o_ref = refs[idx + 6]

    # TODO(synk): pretrained ViT backbone replaced by a patch-embedding linear stand-in.
    h = _mm(x_ref[...], pw[...]) + _f32(pb)                  # patch embed
    for (aw, ab, ag, agb) in adapt_refs:                     # adaptation stages
        h = _mm(h, aw[...]) + _f32(ab)
        h = _layernorm(h, ag, agb)
        h = jax.nn.gelu(h, approximate=False)
    # vision_proj: Linear -> LayerNorm -> Linear -> Dropout(identity @ eval)
    h = _mm(h, w1[...]) + _f32(b1)
    h = _layernorm(h, g, gb)
    h = _mm(h, w2[...]) + _f32(b2)
    o_ref[...] = h.astype(o_ref.dtype)


def _self_attn_kernel(x_ref, wq, bq, wkv, bkv, wo, bo, o_ref, *, heads, scale):
    # TODO(synk): pretrained causal LLM replaced by one residual self-attention block.
    x = x_ref[...].astype(jnp.float32)                       # [S, D]
    out = _mha(x, x, wq, bq, wkv, bkv, wo, bo, heads=heads, scale=scale)
    o_ref[...] = (x + out).astype(o_ref.dtype)


def _cross_pool_contrast_kernel(x_ref, c_ref, wq, bq, wkv, bkv, wo, bo,
                                cw1, cb1, cw2, cb2, cw3, cb3,
                                pooled_ref, contrast_ref, *, heads, scale):
    x = x_ref[...].astype(jnp.float32)                       # [Sq, D]
    ctx = c_ref[...].astype(jnp.float32)                     # [Sk, D]
    attended = _mha(x, ctx, wq, bq, wkv, bkv, wo, bo, heads=heads, scale=scale)
    pooled = jnp.mean(attended, axis=0, keepdims=True)       # [1, D]
    # contrastive head fused as epilogue so it is genuinely computed
    # (Linear-ReLU-Linear-ReLU-Linear), result discarded by the caller.
    h = jnp.maximum(_mm(pooled, cw1[...]) + _f32(cb1), 0.0)
    h = jnp.maximum(_mm(h, cw2[...]) + _f32(cb2), 0.0)
    contrast = _mm(h, cw3[...]) + _f32(cb3)
    pooled_ref[...] = pooled.astype(pooled_ref.dtype)
    contrast_ref[...] = contrast.astype(contrast_ref.dtype)


def _diffusion_kernel(a0_ref, w1a_ref, w1b_ref, b1_ref, wt_ref, w2_ref, b2_ref,
                      a_out_ref, u_out_ref, *, steps, temp):
    # TODO(synk): ActionDiffusion is undefined in the reference; stand-in MLP denoiser.
    # All dims zero-padded to 128 lanes; padded columns provably stay zero.
    a = a0_ref[...]
    u = jnp.zeros_like(a)
    w1a = w1a_ref[...]; w1b = w1b_ref[...]; b1 = b1_ref[...]
    wt = wt_ref[...]; w2 = w2_ref[...]; b2 = b2_ref[...]
    for i in range(steps):                                   # static unroll
        t = steps - 1 - i                                    # reversed(range(steps))
        tt = (float(t) + 1.0) / float(steps)
        h = jnp.tanh(jnp.dot(a, w1a, preferred_element_type=jnp.float32)
                     + jnp.dot(u, w1b, preferred_element_type=jnp.float32)
                     + b1 + tt * wt)
        a = a + temp * (jnp.dot(h, w2, preferred_element_type=jnp.float32) + b2)
        u = jnp.abs(a - jnp.mean(a, axis=0, keepdims=True))
    a_out_ref[...] = a
    u_out_ref[...] = u


# ----------------------------- pallas wrappers --------------------------------
def vision_pipeline(tokens, params, stage_idx):
    M, K = tokens.shape
    TM = M if M <= 256 else 256          # row tile (toy: whole slab, one step)
    assert M % TM == 0
    vp = params["vproj"]
    flat_adapt = []
    for a in params["adapt"][:stage_idx]:
        flat_adapt += [a["w"], a["b"], a["ln_g"], a["ln_b"]]
    ins = [tokens, params["patch_w"], params["patch_b"], *flat_adapt,
           vp["w1"], vp["b1"], vp["ln_g"], vp["ln_b"], vp["w2"], vp["b2"]]
    in_specs = ([pl.BlockSpec((TM, K), lambda i: (i, 0))]
                + [_rep_spec(a.shape) for a in ins[1:]])
    return pl.pallas_call(
        functools.partial(_vision_kernel, n_adapt=stage_idx),
        out_shape=jax.ShapeDtypeStruct((M, LLM_DIM), ACT_DTYPE),
        grid=(M // TM,),
        in_specs=in_specs,
        out_specs=pl.BlockSpec((TM, LLM_DIM), lambda i: (i, 0)),
        compiler_params=pltpu.CompilerParams(dimension_semantics=("parallel",)),
    )(*ins)


def llm_self_attn(x, p):
    Bn, S, D = x.shape
    ins = [x, p["wq"], p["bq"], p["wkv"], p["bkv"], p["wo"], p["bo"]]
    return pl.pallas_call(
        functools.partial(_self_attn_kernel, heads=HEADS, scale=D ** (-0.5)),
        out_shape=jax.ShapeDtypeStruct((Bn, S, D), ACT_DTYPE),
        grid=(Bn,),
        in_specs=[_batch_spec(S, D)] + [_rep_spec(a.shape) for a in ins[1:]],
        out_specs=_batch_spec(S, D),
        compiler_params=pltpu.CompilerParams(dimension_semantics=("parallel",)),
    )(*ins)


def cross_attend_pool(x, context, p_cross, p_contrast):
    Bn, S, D = x.shape
    d3 = p_contrast["w3"].shape[1]
    ins = [x, context,
           p_cross["wq"], p_cross["bq"], p_cross["wkv"], p_cross["bkv"],
           p_cross["wo"], p_cross["bo"],
           p_contrast["w1"], p_contrast["b1"], p_contrast["w2"], p_contrast["b2"],
           p_contrast["w3"], p_contrast["b3"]]
    pooled, contrast = pl.pallas_call(
        functools.partial(_cross_pool_contrast_kernel, heads=HEADS, scale=D ** (-0.5)),
        out_shape=(jax.ShapeDtypeStruct((Bn, 1, D), F32),
                   jax.ShapeDtypeStruct((Bn, 1, d3), F32)),
        grid=(Bn,),
        in_specs=[_batch_spec(S, D), _batch_spec(S, D)]
                 + [_rep_spec(a.shape) for a in ins[2:]],
        out_specs=(pl.BlockSpec((None, 1, D), lambda b: (b, 0, 0)),
                   pl.BlockSpec((None, 1, d3), lambda b: (b, 0, 0))),
        compiler_params=pltpu.CompilerParams(dimension_semantics=("parallel",)),
    )(*ins)
    return pooled[:, 0, :], contrast[:, 0, :]


def run_diffusion(a0_pad, p, steps, temp):
    Bn, A = a0_pad.shape
    ins = [a0_pad, p["w1a"], p["w1b"], p["b1"], p["wt"], p["w2"], p["b2"]]
    return pl.pallas_call(
        functools.partial(_diffusion_kernel, steps=steps, temp=float(temp)),
        out_shape=(jax.ShapeDtypeStruct((Bn, A), F32),
                   jax.ShapeDtypeStruct((Bn, A), F32)),
        grid=(1,),
        in_specs=[_rep_spec(a.shape) for a in ins],
        out_specs=(_rep_spec((Bn, A)), _rep_spec((Bn, A))),
        compiler_params=pltpu.CompilerParams(dimension_semantics=("arbitrary",)),
    )(*ins)


# ------------------------------ parameters ------------------------------------
def init_params(key):
    ks = iter(jax.random.split(key, 64))

    def dense(shape, scale=0.02, dtype=WDT):
        return (scale * jax.random.normal(next(ks), shape, F32)).astype(dtype)

    def zeros(shape, dtype=WDT):
        return jnp.zeros(shape, dtype)

    def ones(shape, dtype=WDT):
        return jnp.ones(shape, dtype)

    def pad2(a, shape):          # zero-pad a 2-D f32 array up to `shape`
        out = jnp.zeros(shape, F32)
        return out.at[:a.shape[0], :a.shape[1]].set(a)

    d1, d2, d3 = CONTRAST_DIMS
    params = {
        # TODO(synk): pretrained ViT backbone replaced by a patch-embedding linear stand-in.
        "patch_w": dense((PATCH_DIM, VISION_DIM)), "patch_b": zeros((1, VISION_DIM)),
        "adapt": [
            {"w": dense((VISION_DIM, VISION_DIM)), "b": zeros((1, VISION_DIM)),
             "ln_g": ones((1, VISION_DIM)), "ln_b": zeros((1, VISION_DIM))}
            for _ in range(N_ADAPT)
        ],
        "vproj": {
            "w1": dense((VISION_DIM, LLM_DIM)), "b1": zeros((1, LLM_DIM)),
            "ln_g": ones((1, LLM_DIM)), "ln_b": zeros((1, LLM_DIM)),
            "w2": dense((LLM_DIM, LLM_DIM)), "b2": zeros((1, LLM_DIM)),
        },
        # TODO(synk): pretrained causal LLM replaced by one self-attention block stand-in.
        "llm_attn": {
            "wq": dense((LLM_DIM, LLM_DIM)), "bq": zeros((1, LLM_DIM)),
            "wkv": dense((LLM_DIM, 2 * LLM_DIM)), "bkv": zeros((1, 2 * LLM_DIM)),
            "wo": dense((LLM_DIM, LLM_DIM)), "bo": zeros((1, LLM_DIM)),
        },
        "cross": {
            "wq": dense((LLM_DIM, LLM_DIM)), "bq": zeros((1, LLM_DIM)),
            "wkv": dense((LLM_DIM, 2 * LLM_DIM)), "bkv": zeros((1, 2 * LLM_DIM)),
            "wo": dense((LLM_DIM, LLM_DIM)), "bo": zeros((1, LLM_DIM)),
        },
        "contrast": {
            "w1": dense((LLM_DIM, d1)), "b1": zeros((1, d1)),
            "w2": dense((d1, d2)), "b2": zeros((1, d2)),
            "w3": dense((d2, d3)), "b3": zeros((1, d3)),
        },
        # diffusion params kept in f32, zero-padded to lane-dense 128/128
        "diff": {
            "w1a": pad2(dense((ACTION_DIM, DIFF_HIDDEN), dtype=F32), (ACT_PAD, HID_PAD)),
            "w1b": pad2(dense((ACTION_DIM, DIFF_HIDDEN), dtype=F32), (ACT_PAD, HID_PAD)),
            "b1": jnp.zeros((1, HID_PAD), F32),
            "wt": pad2(dense((1, DIFF_HIDDEN), dtype=F32), (1, HID_PAD)),
            "w2": pad2(dense((DIFF_HIDDEN, ACTION_DIM), dtype=F32), (HID_PAD, ACT_PAD)),
            "b2": jnp.zeros((1, ACT_PAD), F32),
        },
    }
    return params


# -------------------------------- forward -------------------------------------
def forward(params, images, action_key, stage_idx=0, temp=1.0, num_steps=None):
    Bn = images.shape[0]

    # patchify NCHW -> tokens [B*NP, C*P*P]  (layout plumbing, cheap XLA ops)
    x = images.reshape(Bn, C, IMG // PATCH, PATCH, IMG // PATCH, PATCH)
    x = x.transpose(0, 2, 4, 1, 3, 5).reshape(Bn * NP, PATCH_DIM).astype(ACT_DTYPE)

    # fused vision encoder + adaptation stages + vision_proj  (kernel 1)
    vision_embeds = vision_pipeline(x, params, stage_idx).reshape(Bn, NP, LLM_DIM)

    # LLM stand-in: fused residual self-attention block        (kernel 2)
    llm_features = llm_self_attn(vision_embeds, params["llm_attn"])

    # cross attention (PyTorch calls it twice with identical inputs -> same
    # result; computed once) + mean-pool + contrastive head    (kernel 3)
    attended_pooled, _contrastive = cross_attend_pool(
        llm_features, vision_embeds, params["cross"], params["contrast"])
    # _contrastive is computed but not returned, matching the reference module.

    # action diffusion loop                                    (kernel 4)
    steps = num_steps or NUM_DIFF_STEPS
    a0 = jax.random.normal(action_key, (Bn, ACTION_DIM), F32)
    a0_pad = jnp.pad(a0, ((0, 0), (0, ACT_PAD - ACTION_DIM)))
    actions_pad, unc_pad = run_diffusion(a0_pad, params["diff"], steps, temp)
    actions = actions_pad[:, :ACTION_DIM]
    uncertainty = unc_pad[:, :ACTION_DIM]

    return actions, uncertainty, attended_pooled


# --------------------------------- main ---------------------------------------
if __name__ == "__main__":
    root = jax.random.PRNGKey(0)
    k_params, k_img, k_act = jax.random.split(root, 3)

    params = init_params(k_params)
    images = jax.random.normal(k_img, (B, C, IMG, IMG), F32)   # NCHW like PyTorch

    actions, uncertainty, attended_pooled = forward(params, images, k_act,
                                                    stage_idx=0, temp=1.0)
    jax.block_until_ready((actions, uncertainty, attended_pooled))

    assert actions.shape == (B, ACTION_DIM)
    assert uncertainty.shape == (B, ACTION_DIM)
    assert attended_pooled.shape == (B, LLM_DIM)
    assert actions.dtype == jnp.float32 and attended_pooled.dtype == jnp.float32
    print("KERNEL_OK")
</pallas_src>

<mosaic_0001>
module attributes {stable_mosaic.version = 11 : i64} {
  func.func @_vision_kernel(%arg0: i32, %arg1: memref<32x48xbf16, #tpu.memory_space<vmem>>, %arg2: memref<48x32xbf16, #tpu.memory_space<vmem>>, %arg3: memref<1x32xbf16, #tpu.memory_space<vmem>>, %arg4: memref<32x128xbf16, #tpu.memory_space<vmem>>, %arg5: memref<1x128xbf16, #tpu.memory_space<vmem>>, %arg6: memref<1x128xbf16, #tpu.memory_space<vmem>>, %arg7: memref<1x128xbf16, #tpu.memory_space<vmem>>, %arg8: memref<128x128xbf16, #tpu.memory_space<vmem>>, %arg9: memref<1x128xbf16, #tpu.memory_space<vmem>>, %arg10: memref<32x128xbf16, #tpu.memory_space<vmem>>) attributes {dimension_semantics = [#tpu.dimension_semantics<parallel>], iteration_bounds = array<i64: 1>, scalar_prefetch = 0 : i64, scratch_operands = 0 : i64, tpu.core_type = #tpu.core_type<tc>, window_params = [{transform_indices = @transform_0, window_bounds = array<i64: 32, 48>}, {pipeline_mode = #tpu.pipeline_mode<synchronous>, transform_indices = @transform_1, window_bounds = array<i64: 48, 32>}, {pipeline_mode = #tpu.pipeline_mode<synchronous>, transform_indices = @transform_2, window_bounds = array<i64: 1, 32>}, {pipeline_mode = #tpu.pipeline_mode<synchronous>, transform_indices = @transform_3, window_bounds = array<i64: 32, 128>}, {pipeline_mode = #tpu.pipeline_mode<synchronous>, transform_indices = @transform_4, window_bounds = array<i64: 1, 128>}, {pipeline_mode = #tpu.pipeline_mode<synchronous>, transform_indices = @transform_5, window_bounds = array<i64: 1, 128>}, {pipeline_mode = #tpu.pipeline_mode<synchronous>, transform_indices = @transform_6, window_bounds = array<i64: 1, 128>}, {pipeline_mode = #tpu.pipeline_mode<synchronous>, transform_indices = @transform_7, window_bounds = array<i64: 128, 128>}, {pipeline_mode = #tpu.pipeline_mode<synchronous>, transform_indices = @transform_8, window_bounds = array<i64: 1, 128>}, {transform_indices = @transform_9, window_bounds = array<i64: 32, 128>}]} {
    %c0 = arith.constant 0 : index
    %c0_0 = arith.constant 0 : index
    %0 = vector.load %arg1[%c0, %c0_0] : memref<32x48xbf16, #tpu.memory_space<vmem>>, vector<32x48xbf16>
    %c0_1 = arith.constant 0 : index
    %c0_2 = arith.constant 0 : index
    %1 = vector.load %arg2[%c0_1, %c0_2] : memref<48x32xbf16, #tpu.memory_space<vmem>>, vector<48x32xbf16>
    %cst = arith.constant dense<0.000000e+00> : vector<32x32xf32>
    %2 = tpu.matmul %0, %1, %cst {dimension_numbers = #tpu.dot_dimension_numbers<[1], [0], [0], [1], [0, 0, 1, 1], [], []>} : vector<32x48xbf16>, vector<48x32xbf16>, vector<32x32xf32> -> vector<32x32xf32>
    %c0_3 = arith.constant 0 : index
    %c0_4 = arith.constant 0 : index
    %3 = vector.load %arg3[%c0_3, %c0_4] : memref<1x32xbf16, #tpu.memory_space<vmem>>, vector<1x32xbf16>
    %4 = arith.extf %3 : vector<1x32xbf16> to vector<1x32xf32>
    %5 = vector.broadcast %4 : vector<1x32xf32> to vector<32x32xf32>
    %6 = arith.addf %2, %5 : vector<32x32xf32>
    %c0_5 = arith.constant 0 : index
    %c0_6 = arith.constant 0 : index
    %7 = vector.load %arg4[%c0_5, %c0_6] : memref<32x128xbf16, #tpu.memory_space<vmem>>, vector<32x128xbf16>
    %8 = arith.truncf %6 : vector<32x32xf32> to vector<32x32xbf16>
    %cst_7 = arith.constant dense<0.000000e+00> : vector<32x128xf32>
    %9 = tpu.matmul %8, %7, %cst_7 {dimension_numbers = #tpu.dot_dimension_numbers<[1], [0], [0], [1], [0, 0, 1, 1], [], []>} : vector<32x32xbf16>, vector<32x128xbf16>, vector<32x128xf32> -> vector<32x128xf32>
    %c0_8 = arith.constant 0 : index
    %c0_9 = arith.constant 0 : index
    %10 = vector.load %arg5[%c0_8, %c0_9] : memref<1x128xbf16, #tpu.memory_space<vmem>>, vector<1x128xbf16>
    %11 = arith.extf %10 : vector<1x128xbf16> to vector<1x128xf32>
    %12 = vector.broadcast %11 : vector<1x128xf32> to vector<32x128xf32>
    %13 = arith.addf %9, %12 : vector<32x128xf32>
    %cst_10 = arith.constant dense<0.000000e+00> : vector<32xf32>
    %14 = vector.multi_reduction <add>, %13, %cst_10 [1] : vector<32x128xf32> to vector<32xf32>
    %15 = vector.shape_cast %14 : vector<32xf32> to vector<32x1xf32>
    %cst_11 = arith.constant 1.280000e+02 : f32
    %16 = vector.broadcast %cst_11 : f32 to vector<32x1xf32>
    %17 = arith.divf %15, %16 : vector<32x1xf32>
    %18 = vector.broadcast %17 : vector<32x1xf32> to vector<32x128xf32>
    %19 = arith.subf %13, %18 : vector<32x128xf32>
    %20 = arith.mulf %19, %19 : vector<32x128xf32>
    %cst_12 = arith.constant dense<0.000000e+00> : vector<32xf32>
    %21 = vector.multi_reduction <add>, %20, %cst_12 [1] : vector<32x128xf32> to vector<32xf32>
    %22 = vector.shape_cast %21 : vector<32xf32> to vector<32x1xf32>
    %cst_13 = arith.constant 1.280000e+02 : f32
    %23 = vector.broadcast %cst_13 : f32 to vector<32x1xf32>
    %24 = arith.divf %22, %23 : vector<32x1xf32>
    %25 = vector.broadcast %17 : vector<32x1xf32> to vector<32x128xf32>
    %26 = arith.subf %13, %25 : vector<32x128xf32>
    %cst_14 = arith.constant 9.99999974E-6 : f32
    %27 = vector.broadcast %cst_14 : f32 to vector<32x1xf32>
    %28 = arith.addf %24, %27 : vector<32x1xf32>
    %29 = math.rsqrt %28 : vector<32x1xf32>
    %30 = vector.broadcast %29 : vector<32x1xf32> to vector<32x128xf32>
    %31 = arith.mulf %26, %30 : vector<32x128xf32>
    %c0_15 = arith.constant 0 : index
    %c0_16 = arith.constant 0 : index
    %32 = vector.load %arg6[%c0_15, %c0_16] : memref<1x128xbf16, #tpu.memory_space<vmem>>, vector<1x128xbf16>
    %33 = arith.extf %32 : vector<1x128xbf16> to vector<1x128xf32>
    %34 = vector.broadcast %33 : vector<1x128xf32> to vector<32x128xf32>
    %35 = arith.mulf %31, %34 : vector<32x128xf32>
    %c0_17 = arith.constant 0 : index
    %c0_18 = arith.constant 0 : index
    %36 = vector.load %arg7[%c0_17, %c0_18] : memref<1x128xbf16, #tpu.memory_space<vmem>>, vector<1x128xbf16>
    %37 = arith.extf %36 : vector<1x128xbf16> to vector<1x128xf32>
    %38 = vector.broadcast %37 : vector<1x128xf32> to vector<32x128xf32>
    %39 = arith.addf %35, %38 : vector<32x128xf32>
    %c0_19 = arith.constant 0 : index
    %c0_20 = arith.constant 0 : index
    %40 = vector.load %arg8[%c0_19, %c0_20] : memref<128x128xbf16, #tpu.memory_space<vmem>>, vector<128x128xbf16>
    %41 = arith.truncf %39 : vector<32x128xf32> to vector<32x128xbf16>
    %cst_21 = arith.constant dense<0.000000e+00> : vector<32x128xf32>
    %42 = tpu.matmul %41, %40, %cst_21 {dimension_numbers = #tpu.dot_dimension_numbers<[1], [0], [0], [1], [0, 0, 1, 1], [], []>} : vector<32x128xbf16>, vector<128x128xbf16>, vector<32x128xf32> -> vector<32x128xf32>
    %c0_22 = arith.constant 0 : index
    %c0_23 = arith.constant 0 : index
    %43 = vector.load %arg9[%c0_22, %c0_23] : memref<1x128xbf16, #tpu.memory_space<vmem>>, vector<1x128xbf16>
    %44 = arith.extf %43 : vector<1x128xbf16> to vector<1x128xf32>
    %45 = vector.broadcast %44 : vector<1x128xf32> to vector<32x128xf32>
    %46 = arith.addf %42, %45 : vector<32x128xf32>
    %47 = arith.truncf %46 : vector<32x128xf32> to vector<32x128xbf16>
    %c0_24 = arith.constant 0 : index
    %c0_25 = arith.constant 0 : index
    %48 = vector.load %arg10[%c0_24, %c0_25] : memref<32x128xbf16, #tpu.memory_space<vmem>>, vector<32x128xbf16>
    tpu.vector_store %arg10[%c0_24, %c0_25], %47 {strides = array<i32>} : memref<32x128xbf16, #tpu.memory_space<vmem>>, vector<32x128xbf16>,
    return
  }
  func.func @transform_0(%arg0: i32) -> (i32, i32) {
    %c0_i32 = arith.constant 0 : i32
    %c0_i32_0 = arith.constant 0 : i32
    return %arg0, %c0_i32 : i32, i32
  }
  func.func @transform_1(%arg0: i32) -> (i32, i32) {
    %c0_i32 = arith.constant 0 : i32
    %c0_i32_0 = arith.constant 0 : i32
    %c0_i32_1 = arith.constant 0 : i32
    return %c0_i32, %c0_i32_0 : i32, i32
  }
  func.func @transform_2(%arg0: i32) -> (i32, i32) {
    %c0_i32 = arith.constant 0 : i32
    %c0_i32_0 = arith.constant 0 : i32
    %c0_i32_1 = arith.constant 0 : i32
    return %c0_i32, %c0_i32_0 : i32, i32
  }
  func.func @transform_3(%arg0: i32) -> (i32, i32) {
    %c0_i32 = arith.constant 0 : i32
    %c0_i32_0 = arith.constant 0 : i32
    %c0_i32_1 = arith.constant 0 : i32
    return %c0_i32, %c0_i32_0 : i32, i32
  }
  func.func @transform_4(%arg0: i32) -> (i32, i32) {
    %c0_i32 = arith.constant 0 : i32
    %c0_i32_0 = arith.constant 0 : i32
    %c0_i32_1 = arith.constant 0 : i32
    return %c0_i32, %c0_i32_0 : i32, i32
  }
  func.func @transform_5(%arg0: i32) -> (i32, i32) {
    %c0_i32 = arith.constant 0 : i32
    %c0_i32_0 = arith.constant 0 : i32
    %c0_i32_1 = arith.constant 0 : i32
    return %c0_i32, %c0_i32_0 : i32, i32
  }
  func.func @transform_6(%arg0: i32) -> (i32, i32) {
    %c0_i32 = arith.constant 0 : i32
    %c0_i32_0 = arith.constant 0 : i32
    %c0_i32_1 = arith.constant 0 : i32
    return %c0_i32, %c0_i32_0 : i32, i32
  }
  func.func @transform_7(%arg0: i32) -> (i32, i32) {
    %c0_i32 = arith.constant 0 : i32
    %c0_i32_0 = arith.constant 0 : i32
    %c0_i32_1 = arith.constant 0 : i32
    return %c0_i32, %c0_i32_0 : i32, i32
  }
  func.func @transform_8(%arg0: i32) -> (i32, i32) {
    %c0_i32 = arith.constant 0 : i32
    %c0_i32_0 = arith.constant 0 : i32
    %c0_i32_1 = arith.constant 0 : i32
    return %c0_i32, %c0_i32_0 : i32, i32
  }
  func.func @transform_9(%arg0: i32) -> (i32, i32) {
    %c0_i32 = arith.constant 0 : i32
    %c0_i32_0 = arith.constant 0 : i32
    return %arg0, %c0_i32 : i32, i32
  }
}

</mosaic_0001>

<bundles_post_ra>
// kernel: tpu_custom_call.1
= control target key start
LH: loop header
LB: loop body
LE: loop exit
PB: predicated region body
PF: predicated region fallthrough
CT: control target
= control target key end

     0   :  { %14 = vsyncpa [#allocation3], 0  ;;  %s915_s0 = inlined_call_operand.hbm [shape: bf16[32,48], index: 0, kind: input, shape index: {}]   ;;  %s916_s1 = inlined_call_operand.vmem [shape: bf16[48,32], index: 1, kind: input, shape index: {}]   ;;  %s917_s2 = inlined_call_operand.vmem [shape: bf16[1,32], index: 2, kind: input, shape index: {}]   ;;  %s918_s3 = inlined_call_operand.hbm [shape: bf16[32,128], index: 3, kind: input, shape index: {}]   ;;  %s919_s4 = inlined_call_operand.vmem [shape: bf16[1,128], index: 4, kind: input, shape index: {}]   ;;  %s920_s5 = inlined_call_operand.hbm [shape: bf16[1,128], index: 5, kind: input, shape index: {}]   ;;  %s921_s6 = inlined_call_operand.hbm [shape: bf16[1,128], index: 6, kind: input, shape index: {}]   ;;  %s922_s7 = inlined_call_operand.vmem [shape: bf16[128,128], index: 7, kind: input, shape index: {}]   ;;  %s923_s8 = inlined_call_operand.vmem [shape: bf16[1,128], index: 8, kind: input, shape index: {}]   ;;  %s924_s9 = inlined_call_operand.hbm [shape: bf16[32,128], index: 9, kind: output, shape index: {}]  }
   0x1   :  { %15 = vsyncpa [#allocation6], 0 }
   0x2   :  { %16 = vsyncpa [#allocation9], 0 }
   0x3   :  { %17 = vsyncpa [#allocation4], 0  ;;  %s733_s30 = smov [#allocation5]   ;;  %s734_s11 = smov [#allocation2]  }
   0x4   :  { %s39_s10 = sshll.u32 %s733_s30, 4  ;;  %s23_s12 = sshll.u32 %s734_s11, 4  ;;  %s40_s10 = int_to_ptr.vmem [resolvable:$true] %s39_s10  ;;  %s790_s12 = int_to_ptr.vmem [resolvable:$true] %s23_s12 }
   0x5   :  { %s615_s15 = scalar_lea.hbm %s918_s3, 256 }
   0x6   :  { %p616_p0 = scmp.ne.s32.totalorder %s918_s3, %s615_s15  ;;  %p619_p1 = scmp.lt.u32.totalorder %s615_s15, %s918_s3 }
   0x8   :  { %p621_p2 = pnand %p619_p1, %p616_p0 }
   0xa   :  { %624 = shalt.err (!%p621_p2)
}
   0xb   :  { %s625_s20 = scalar_lea.vmem %s40_s10, 256  ;;  %p630_p4 = scmp.lt.s32.totalorder %s40_s10, %s40_s10 }
   0xc   :  { %p626_p3 = scmp.ne.s32.totalorder %s40_s10, %s625_s20  ;;  %p631_p5 = scmp.lt.s32.totalorder %s625_s20, %s625_s20 }
   0xe   :  { %p632_p6 = por %p631_p5, %p630_p4 }
  0x10   :  { %p633_p7 = pnand %p632_p6, %p626_p3 }
  0x12   :  { %636 = shalt.err (!%p633_p7)
}
  0x13   :  { %s735_s21 = smov 64   ;;  %s736_s22 = smov 4  }
  0x14   :  { %45 = dma.hbm_to_vmem [thread:$0]  %s918_s3, 256, %s40_s10, [#allocation6], %s735_s21, %s735_s21, %s736_s22  }
  0x15   :  { %s637_s27 = scalar_lea.hbm %s915_s0, 256 }
  0x16   :  { %p638_p8 = scmp.ne.s32.totalorder %s915_s0, %s637_s27  ;;  %p641_p9 = scmp.lt.u32.totalorder %s637_s27, %s915_s0 }
  0x18   :  { %p643_p10 = pnand %p641_p9, %p638_p8 }
  0x1a   :  { %646 = shalt.err (!%p643_p10)
}
  0x1b   :  { %s647_s13 = scalar_lea.vmem %s790_s12, 256  ;;  %p652_p12 = scmp.lt.s32.totalorder %s790_s12, %s790_s12 }
  0x1c   :  { %p648_p11 = scmp.ne.s32.totalorder %s790_s12, %s647_s13  ;;  %p653_p13 = scmp.lt.s32.totalorder %s647_s13, %s647_s13 }
  0x1e   :  { %p654_p0 = por %p653_p13, %p652_p12 }
  0x20   :  { %p655_p1 = pnand %p654_p0, %p648_p11 }
  0x22   :  { %658 = shalt.err (!%p655_p1)
}
  0x23   :  { %29 = dma.hbm_to_vmem [thread:$0]  %s915_s0, 256, %s790_s12, [#allocation3], %s735_s21, %s735_s21, %s736_s22  }
  0x24   :  { %s737_s14 = smov [#allocation7]   ;;  %s738_s16 = smov [#allocation8]  }
  0x25   :  { %s54_s15 = sshll.u32 %s737_s14, 4  ;;  %s64_s17 = sshll.u32 %s738_s16, 4  ;;  %s55_s15 = int_to_ptr.vmem [resolvable:$true] %s54_s15  ;;  %s65_s17 = int_to_ptr.vmem [resolvable:$true] %s64_s17 }
  0x26   :  { %s659_s20 = scalar_lea.hbm %s920_s5, 16 }
  0x27   :  { %p660_p2 = scmp.ne.s32.totalorder %s920_s5, %s659_s20  ;;  %p663_p3 = scmp.lt.u32.totalorder %s659_s20, %s920_s5 }
  0x29   :  { %p665_p4 = pnand %p663_p3, %p660_p2 }
  0x2b   :  { %668 = shalt.err (!%p665_p4)
}
  0x2c   :  { %s669_s0 = scalar_lea.vmem %s55_s15, 16  ;;  %s673_s12 = scalar_lea.vmem %s55_s15, 32 }
  0x2d   :  { %p670_p5 = scmp.ne.s32.totalorder %s55_s15, %s669_s0  ;;  %p674_p6 = scmp.lt.s32.totalorder %s55_s15, %s55_s15 }
  0x2e   :  { %p675_p7 = scmp.lt.s32.totalorder %s673_s12, %s669_s0 }
  0x30   :  { %p676_p8 = por %p675_p7, %p674_p6 }
  0x32   :  { %p677_p9 = pnand %p676_p8, %p670_p5 }
  0x34   :  { %680 = shalt.err (!%p677_p9)
}
  0x35   :  { %57 = dma.hbm_to_vmem [thread:$0]  %s920_s5, 16, %s55_s15, [#allocation6]  }
  0x36   :  { %s681_s11 = scalar_lea.hbm %s921_s6, 16 }
  0x37   :  { %p682_p10 = scmp.ne.s32.totalorder %s921_s6, %s681_s11  ;;  %p685_p11 = scmp.lt.u32.totalorder %s681_s11, %s921_s6 }
  0x39   :  { %p687_p12 = pnand %p685_p11, %p682_p10 }
  0x3b   :  { %690 = shalt.err (!%p687_p12)
}
  0x3c   :  { %s691_s16 = scalar_lea.vmem %s65_s17, 16  ;;  %s695_s18 = scalar_lea.vmem %s65_s17, 32 }
  0x3d   :  { %p692_p13 = scmp.ne.s32.totalorder %s65_s17, %s691_s16  ;;  %p696_p0 = scmp.lt.s32.totalorder %s65_s17, %s65_s17 }
  0x3e   :  { %p697_p1 = scmp.lt.s32.totalorder %s695_s18, %s691_s16 }
  0x40   :  { %p698_p2 = por %p697_p1, %p696_p0 }
  0x42   :  { %p699_p3 = pnand %p698_p2, %p692_p13 }
  0x44   :  { %702 = shalt.err (!%p699_p3)
}
  0x45   :  { %67 = dma.hbm_to_vmem [thread:$0]  %s921_s6, 16, %s65_s17, [#allocation9]  }
  0x46   :  { %725 = dma.done.wait [#allocation3], 256  }
  0x47   :  { %726 = vsyncadd [#allocation3], 4294967040 }
  0x48   :  { %727 = dma.done.wait [#allocation6], 272  }
  0x49   :  { %728 = vsyncadd [#allocation6], 4294967024 }
  0x4a   :  { %729 = dma.done.wait [#allocation9], 16  }
  0x4b   :  { %730 = vsyncadd [#allocation9], 4294967280  ;;  %v592_v0 = vld [vmem:[%s916_s1] sm:$0xff]   ;;  %v593_v1 = vld [vmem:[%s916_s1 + $0x8] sm:$0xff]   ;;  %vm129_vm0 = vcmask 392192   ;;  %v97_v7 = vlaneseq  ;;  %vm209_vm1 = vcmask 261120  }
  0x4c   :  { %547 = vmatprep.subr.bf16.mxu0 %v592_v0  ;;  %v595_v2 = vld [vmem:[#allocation2] sm:$0xff]   ;;  %v594_v3 = vld [vmem:[%s916_s1 + $0x10] sm:$0xff]   ;;  %v596_v4 = vld [vmem:[#allocation2 + $0x8] sm:$0xff]   ;;  %s739_s20 = smov [#allocation10]  }
  0x4d   :  { %548 = vmatpush3.bf16.msra.mxu0 %v592_v0  ;;  %553 = vmatprep.mubr.msk.bf16.mxu0 %vm129_vm0, %v595_v2  ;;  %v597_v5 = vld [vmem:[#allocation5] sm:$0xff]   ;;  %v598_v6 = vld [vmem:[#allocation5 + $0x8] sm:$0xff]   ;;  %v98_v8 = vshrl.u32 %v97_v7, 7  ;;  %v95_v9 = vld [vmem:[%s917_s2] sm:$0x1]  ;;  %s476_s23 = sshll.u32 %s739_s20, 4  ;;  %s477_s23 = int_to_ptr.vmem [resolvable:$true] %s476_s23 }
  0x4e   :  { %549 = vmatprep.subr.bf16.mxu0 %v593_v1  ;;  %v96_v10 = vunpack.c.l.bf16 %v95_v9  ;;  %v191_v23 = vld [vmem:[%s919_s4] sm:$0x1]  ;;  %v600_v51 = vld [vmem:[%s922_s7 + $0x8] sm:$0xff]   ;;  %v601_v52 = vld [vmem:[%s922_s7 + $0x10] sm:$0xff]   ;;  %s703_s24 = scalar_lea.vmem %s477_s23, 256  ;;  %p708_p5 = scmp.lt.s32.totalorder %s477_s23, %s477_s23 }
  0x4f   :  { %v863_v11 = vsub.s32 0, %v98_v8  ;;  %v192_v24 = vunpack.c.l.bf16 %v191_v23  ;;  %v599_v34 = vld [vmem:[%s922_s7] sm:$0xff]   ;;  %v602_v53 = vld [vmem:[%s922_s7 + $0x18] sm:$0xff]   ;;  %v604_v55 = vld [vmem:[%s922_s7 + $0x28] sm:$0xff]   ;;  %p704_p4 = scmp.ne.s32.totalorder %s477_s23, %s703_s24  ;;  %p709_p6 = scmp.lt.s32.totalorder %s703_s24, %s703_s24 }
  0x50   :  { %565 = vmatprep.subr.bf16.mxu1 %v599_v34  ;;  %v603_v54 = vld [vmem:[%s922_s7 + $0x20] sm:$0xff]   ;;  %v605_v56 = vld [vmem:[%s922_s7 + $0x30] sm:$0xff]   ;;  %v606_v57 = vld [vmem:[%s922_s7 + $0x38] sm:$0xff]  }
  0x51   :  { %550 = vmatpush3.bf16.msra.mxu0 %v593_v1  ;;  %v100_v12 = vrot.slane %v96_v10, %v863_v11  ;;  %v196_v25 = vrot.slane %v192_v24, %v863_v11  ;;  %566 = vmatpush3.bf16.msra.mxu1 %v599_v34  ;;  %v320_v8 = vld [vmem:[#allocation8] sm:$0x1]  ;;  %p710_p7 = por %p709_p6, %p708_p5 }
  0x52   :  { %551 = vmatprep.subr.bf16.mxu0 %v594_v3  ;;  %567 = vmatprep.subr.bf16.mxu1 %v600_v51 }
  0x53   :  { %p711_p8 = pnand %p710_p7, %p704_p4 }
  0x55   :  { %552 = vmatpush3.bf16.msra.mxu0 %v594_v3  ;;  %568 = vmatpush3.bf16.msra.mxu1 %v600_v51 }
  0x56   :  { %557 = vmatprep.subr.bf16.mxu0 %v597_v5  ;;  %569 = vmatprep.subr.bf16.mxu1 %v601_v52 }
  0x58   :  { %554 = vmatmul.mubr.msk.bf16.vlgmr.msra.gmra.mrb[0].mxu0 %vm129_vm0, %v596_v4 }
  0x59   :  { %558 = vmatpush3.bf16.msra.mxu0 %v597_v5  ;;  %570 = vmatpush3.bf16.msra.mxu1 %v601_v52  ;;  %v310_v5 = vld [vmem:[#allocation7] sm:$0x1] }
  0x5a   :  { %559 = vmatprep.subr.bf16.mxu0 %v598_v6  ;;  %571 = vmatprep.subr.bf16.mxu1 %v602_v53  ;;  %v311_v7 = vunpack.c.l.bf16 %v310_v5 }
  0x5d   :  { %560 = vmatpush3.bf16.msra.mxu0 %v598_v6  ;;  %572 = vmatpush3.bf16.msra.mxu1 %v602_v53 }
  0x5e   :  { %573 = vmatprep.subr.bf16.mxu1 %v603_v54 }
  0x61   :  { %574 = vmatpush3.bf16.msra.mxu1 %v603_v54 }
  0x62   :  { %575 = vmatprep.subr.bf16.mxu1 %v604_v55 }
  0x65   :  { %576 = vmatpush3.bf16.msra.mxu1 %v604_v55 }
  0x66   :  { %577 = vmatprep.subr.bf16.mxu1 %v605_v56 }
  0x69   :  { %578 = vmatpush3.bf16.msra.mxu1 %v605_v56 }
  0x6a   :  { %579 = vmatprep.subr.bf16.mxu1 %v606_v57 }
  0x6d   :  { %580 = vmatpush3.bf16.msra.mxu1 %v606_v57 }
 0x12b   :  { %v555_v13 = vpop.f32.mrb[0].mxu0 }
 0x12c   :  { %v170_v14 = vpop.f32.mrb[1].mxu0  ;;  %v179_v16 = vadd.f32 %v555_v13, %v100_v12  ;;  %v321_v13 = vunpack.c.l.bf16 %v320_v8 }
 0x12d   :  { %v556_v15 = vpop.f32.mrb[2].mxu0  ;;  %v171_v19 = vadd.f32 %v170_v14, %v100_v12 }
 0x12e   :  { %v182_v17 = vadd.f32 %v556_v15, %v100_v12  ;;  %v173_v18 = vpop.f32.mrb[3].mxu0 }
 0x12f   :  { %v174_v20 = vadd.f32 %v173_v18, %v100_v12  ;;  %v315_v12 = vrot.slane %v311_v7, %v863_v11  ;;  %v325_v18 = vrot.slane %v321_v13, %v863_v11 }
 0x130   :  { %v190_v21 = vpack.c.bf16 %v182_v17, %v179_v16 }
 0x131   :  { %v189_v22 = vpack.c.bf16 %v174_v20, %v171_v19 }
 0x133   :  { %561 = vmatprep.mubr.msk.bf16.mxu0 %vm209_vm1, %v189_v22 }
 0x134   :  { %562 = vmatmul.mubr.msk.bf16.vlgmr.msra.gmra.mrb[4].mxu0 %vm209_vm1, %v190_v21 }
 0x207   :  { %v563_v26 = vpop.f32.mrb[4].mxu0 }
 0x208   :  { %v259_v27 = vadd.f32 %v563_v26, %v196_v25  ;;  %v250_v28 = vpop.f32.mrb[5].mxu0 }
 0x209   :  { %v251_v29 = vadd.f32 %v250_v28, %v196_v25  ;;  %v564_v30 = vpop.f32.mrb[6].mxu0 }
 0x20a   :  { %269 = vadd.xlane.f32.xlu1 %v259_v27  ;;  %v253_v31 = vpop.f32.mrb[7].mxu0  ;;  %v262_v32 = vadd.f32 %v564_v30, %v196_v25 }
 0x20b   :  { %265 = vadd.xlane.f32.xlu0 %v251_v29  ;;  %v254_v33 = vadd.f32 %v253_v31, %v196_v25  ;;  %v348_v31 = vld [vmem:[%s923_s8] sm:$0x1] }
 0x20e   :  { %271 = vadd.xlane.f32.xlu1 %v262_v32 }
 0x20f   :  { %267 = vadd.xlane.f32.xlu0 %v254_v33 }
 0x297   :  { %v270_v35 = vpop.xlane.xlu1 %269 }
 0x298   :  { %v266_v36 = vpop.xlane.xlu0 %265  ;;  %v276_v37 = vmul.f32 0.0078125, %v270_v35 }
 0x299   :  { %v274_v38 = vmul.f32 0.0078125, %v266_v36 }
 0x29a   :  { %v280_v42 = vsub.f32 %v259_v27, %v276_v37 }
 0x29b   :  { %v278_v39 = vsub.f32 %v251_v29, %v274_v38  ;;  %v272_v40 = vpop.xlane.xlu1 %271 }
 0x29c   :  { %v268_v41 = vpop.xlane.xlu0 %267  ;;  %v277_v43 = vmul.f32 0.0078125, %v272_v40  ;;  %v284_v48 = vmul.f32 %v280_v42, %v280_v42 }
 0x29d   :  { %v275_v44 = vmul.f32 0.0078125, %v268_v41  ;;  %v282_v45 = vmul.f32 %v278_v39, %v278_v39 }
 0x29e   :  { %v281_v47 = vsub.f32 %v262_v32, %v277_v43  ;;  %v349_v32 = vunpack.c.l.bf16 %v348_v31 }
 0x29f   :  { %v279_v46 = vsub.f32 %v254_v33, %v275_v44  ;;  %286 = vadd.xlane.f32.xlu0 %v282_v45 }
 0x2a0   :  { %v285_v50 = vmul.f32 %v281_v47, %v281_v47  ;;  %v353_v33 = vrot.slane %v349_v32, %v863_v11 }
 0x2a1   :  { %v283_v49 = vmul.f32 %v279_v46, %v279_v46 }
 0x2a3   :  { %290 = vadd.xlane.f32.xlu0 %v284_v48  ;;  %288 = vadd.xlane.f32.xlu1 %v283_v49 }
 0x2a7   :  { %292 = vadd.xlane.f32.xlu1 %v285_v50 }
 0x32c   :  { %v287_v58 = vpop.xlane.xlu0 %286 }
 0x32d   :  { %v294_v59 = vmul.f32 0.0078125, %v287_v58 }
 0x32f   :  { %v298_v60 = vadd.f32 1e-05, %v294_v59 }
 0x330   :  { %v289_v61 = vpop.xlane.xlu1 %288  ;;  %v291_v62 = vpop.xlane.xlu0 %290 }
 0x331   :  { %607 = vrsqrt.f32 %v298_v60  ;;  %v295_v63 = vmul.f32 0.0078125, %v289_v61  ;;  %v296_v0 = vmul.f32 0.0078125, %v291_v62 }
 0x333   :  { %v299_v1 = vadd.f32 1e-05, %v295_v63  ;;  %v300_v2 = vadd.f32 1e-05, %v296_v0 }
 0x334   :  { %v293_v3 = vpop.xlane.xlu1 %292 }
 0x335   :  { %609 = vrsqrt.f32 %v299_v1  ;;  %v297_v4 = vmul.f32 0.0078125, %v293_v3 }
 0x336   :  { %611 = vrsqrt.f32 %v300_v2 }
 0x337   :  { %v301_v6 = vadd.f32 1e-05, %v297_v4 }
 0x339   :  { %613 = vrsqrt.f32 %v301_v6 }
 0x33b   :  { %v608_v9 = vpop.eup %607 }
 0x33c   :  { %v306_v10 = vmul.f32 %v608_v9, %v278_v39 }
 0x33e   :  { %v316_v17 = vmul.f32 %v315_v12, %v306_v10 }
 0x33f   :  { %v610_v14 = vpop.eup %609 }
 0x340   :  { %v612_v15 = vpop.eup %611  ;;  %v307_v16 = vmul.f32 %v610_v14, %v279_v46  ;;  %v326_v22 = vadd.f32 %v325_v18, %v316_v17 }
 0x341   :  { %v308_v19 = vmul.f32 %v612_v15, %v280_v42 }
 0x342   :  { %v317_v20 = vmul.f32 %v315_v12, %v307_v16 }
 0x343   :  { %v614_v21 = vpop.eup %613  ;;  %v318_v25 = vmul.f32 %v315_v12, %v308_v19 }
 0x344   :  { %v327_v23 = vadd.f32 %v325_v18, %v317_v20  ;;  %v309_v24 = vmul.f32 %v614_v21, %v281_v47 }
 0x345   :  { %v328_v28 = vadd.f32 %v325_v18, %v318_v25 }
 0x346   :  { %v346_v26 = vpack.c.bf16 %v327_v23, %v326_v22  ;;  %v319_v27 = vmul.f32 %v315_v12, %v309_v24 }
 0x348   :  { %581 = vmatprep.mubr.bf16.mxu1 %v346_v26  ;;  %v329_v29 = vadd.f32 %v325_v18, %v319_v27 }
 0x34a   :  { %v347_v30 = vpack.c.bf16 %v329_v29, %v328_v28 }
 0x34c   :  { %582 = vmatmul.mubr.bf16.vlgmr.msra.gmra.mrb[0].mxu1 %v347_v30 }
 0x41f   :  { %v583_v34 = vpop.f32.mrb[0].mxu1 }
 0x420   :  { %v436_v35 = vpop.f32.mrb[1].mxu1  ;;  %v445_v37 = vadd.f32 %v583_v34, %v353_v33 }
 0x421   :  { %v584_v36 = vpop.f32.mrb[2].mxu1  ;;  %v437_v40 = vadd.f32 %v436_v35, %v353_v33 }
 0x422   :  { %v448_v38 = vadd.f32 %v584_v36, %v353_v33  ;;  %v439_v39 = vpop.f32.mrb[3].mxu1 }
 0x423   :  { %v440_v41 = vadd.f32 %v439_v39, %v353_v33 }
 0x424   :  { %v525_v42 = vpack.c.bf16 %v448_v38, %v445_v37 }
 0x425   :  { %v520_v43 = vpack.c.bf16 %v440_v41, %v437_v40 }
 0x426   :  { %527 = vst [vmem:[#allocation10 + $0x8] sm:$0xff] %v525_v42  }
 0x427   :  { %521 = vst [vmem:[#allocation10] sm:$0xff] %v520_v43  }
 0x428   :  { %714 = shalt.err (!%p711_p8)
}
 0x429   :  { %s715_s17 = scalar_lea.hbm %s924_s9, 256 }
 0x42a   :  { %p716_p9 = scmp.ne.s32.totalorder %s924_s9, %s715_s17  ;;  %p719_p10 = scmp.lt.u32.totalorder %s715_s17, %s924_s9 }
 0x42c   :  { %p721_p11 = pnand %p719_p10, %p716_p9 }
 0x42e   :  { %724 = shalt.err (!%p721_p11)
}
 0x42f   :  { %482 = dma.vmem_to_hbm [thread:$0]  %s477_s23, 256, %s924_s9, [#allocation4], %s735_s21, %s735_s21, %s736_s22  }
 0x430   :  { %731 = dma.done.wait [#allocation4], 256  }
 0x431   :  { %732 = vsyncadd [#allocation4], 4294967040 }
 0x432   :  { %486 = vsyncpa [#allocation3], 1 }
 0x433   :  { %487 = vsyncpa [#allocation6], 1 }
 0x434   :  { %488 = vsyncpa [#allocation9], 1 }
 0x435   :  { %489 = vsyncpa [#allocation4], 1 }

</bundles_post_ra>
